<compile_context>
chip_gen: v7x
topology: tpu7x:2x2x1
jax: 0.10.0
libtpu: 0.0.40
codegen_flags: <defaults>
</compile_context>

<pallas_src>
import numpy as np

import jax
import jax.numpy as jnp
from jax.experimental import pallas as pl
from jax.experimental.pallas import tpu as pltpu


def _build_pe(window: int, d_model: int, encoding_length: float = 10000.0) -> np.ndarray:
    """Positional-encoding table matching the PyTorch loop exactly.

    For column j the PyTorch module uses exponent 2*j/d_model for BOTH even
    (sin) and odd (cos) columns (odd column i+1 uses 2*(i+1)/d_model), so:
        angle = pos / L**(2*j/d_model); even j -> sin, odd j -> cos.
    (Note this intentionally differs from the canonical paired-frequency PE.)
    """
    pos = np.arange(window, dtype=np.float64)[:, None]            # (window, 1)
    j = np.arange(d_model, dtype=np.float64)[None, :]              # (1, d_model)
    angle = pos / np.power(float(encoding_length), 2.0 * j / d_model)
    even = (np.arange(d_model)[None, :] % 2 == 0)
    pe = np.where(even, np.sin(angle), np.cos(angle))
    return pe.astype(np.float32)                                   # (window, d_model)


def _round_up(x: int, m: int) -> int:
    return ((x + m - 1) // m) * m


def _pick_tile(extent: int, unit: int, cap: int) -> tuple[int, int]:
    """Return (tile, padded_extent).

    `tile` is a multiple of `unit`, at most `cap` (rounded down to `unit`),
    and divides `padded_extent`. `padded_extent` = extent rounded up to a
    multiple of `unit` (padding waste is always < unit).
    """
    padded = _round_up(extent, unit)
    cap = max(unit, (cap // unit) * unit)
    if padded <= cap:
        return padded, padded
    best = unit
    for t in range(cap, unit - 1, -unit):   # trace-time only; <= cap/unit iters
        if padded % t == 0:
            best = t
            break
    return best, padded


def _add_pe_kernel(x_ref, pe_ref, o_ref):
    # x_ref / o_ref: (B_tile, L_tile); pe_ref: (1, L_tile).
    # VPU broadcast of pe over the batch (sublane) dimension; add in f32.
    x = x_ref[...].astype(jnp.float32)
    p = pe_ref[...].astype(jnp.float32)
    o_ref[...] = (x + p).astype(o_ref.dtype)


def add_positional_encoding(x: jnp.ndarray, pe_flat: jnp.ndarray, *,
                            target_tile_bytes: int = 4 << 20,
                            vmem_limit_bytes: int = 32 * 1024 * 1024,
                            donate_x: bool = False) -> jnp.ndarray:
    """x: (B, S, D); pe_flat: (1, S*D) already in x.dtype. Returns x + pe."""
    B, S, D = x.shape
    L = S * D
    if pe_flat.shape != (1, L):
        raise ValueError(f"pe_flat {pe_flat.shape} does not match (1, {L})")

    itemsize = jnp.dtype(x.dtype).itemsize
    # dtype-aware sublane packing: f32 -> 8 rows/vreg group, bf16 -> 16, int8 -> 32.
    base = max(8, 32 // itemsize)

    # Lane-dense layout: last dim becomes S*D.
    x2 = x.reshape(B, L)
    pe2 = pe_flat.astype(x.dtype)

    # Batch tile: multiple of the sublane base, capped at 64 rows.
    B_tile, B_pad = _pick_tile(B, base, max(base, 64))
    # Lane tile: multiple of 128, >= 512 when possible (v5e store width),
    # sized so B_tile * L_tile ~= target_tile_bytes.
    lane_budget = max(512, target_tile_bytes // (B_tile * itemsize))
    L_tile, L_pad = _pick_tile(L, 128, lane_budget)

    padded = (B_pad != B) or (L_pad != L)
    if padded:
        x2 = jnp.pad(x2, ((0, B_pad - B), (0, L_pad - L)))
    if L_pad != L:
        pe2 = jnp.pad(pe2, ((0, 0), (0, L_pad - L)))

    # Lane axis OUTER, batch INNER: pe's block index (0, l) is constant across
    # the inner sweep, so Pallas skips the redundant pe DMA.
    grid = (L_pad // L_tile, B_pad // B_tile)

    bytes_accessed = (2 * B_pad * L_pad + L_pad) * itemsize
    # Donation is opt-in: only safe/useful when the caller no longer needs x.
    io_aliases = {0: 0} if donate_x else {}

    out2 = pl.pallas_call(
        _add_pe_kernel,
        out_shape=jax.ShapeDtypeStruct((B_pad, L_pad), x.dtype),
        grid_spec=pltpu.PrefetchScalarGridSpec(
            num_scalar_prefetch=0,
            grid=grid,
            in_specs=[
                pl.BlockSpec((B_tile, L_tile), lambda l, b: (b, l)),
                pl.BlockSpec((1, L_tile), lambda l, b: (0, l)),
            ],
            out_specs=pl.BlockSpec((B_tile, L_tile), lambda l, b: (b, l)),
        ),
        compiler_params=pltpu.CompilerParams(
            dimension_semantics=("parallel", "parallel"),
            vmem_limit_bytes=vmem_limit_bytes,
        ),
        cost_estimate=pl.CostEstimate(
            flops=int(B_pad * L_pad),
            transcendentals=0,
            bytes_accessed=int(bytes_accessed),
        ),
        input_output_aliases=io_aliases,
    )(x2, pe2)

    if padded:
        out2 = out2[:B, :L]
    return out2.reshape(B, S, D)


class PositionalEncoder:
    """JAX/Pallas analogue of the PyTorch PositionalEncoder module.

    The pe table is built once at init (host-side numpy), and the flattened
    (1, S*D) row used by the kernel is cached per (seq, dtype), so a forward
    call launches exactly one Pallas kernel.
    """

    def __init__(self, d_model: int, window: int, encoding_length: float = 10000.0):
        self.d_model = d_model
        self.window = window
        self.pe = _build_pe(window, d_model, encoding_length)   # (window, d_model) f32
        self._flat_cache: dict = {}

    def _flat_pe(self, seq: int, dtype) -> jnp.ndarray:
        key = (int(seq), jnp.dtype(dtype).name)
        if key not in self._flat_cache:
            flat = jnp.asarray(self.pe[:seq].reshape(1, seq * self.d_model)).astype(dtype)
            self._flat_cache[key] = flat
        return self._flat_cache[key]

    def __call__(self, x: jnp.ndarray, *, donate_x: bool = False) -> jnp.ndarray:
        B, S, D = x.shape
        if D != self.d_model or S > self.window:
            raise ValueError(f"input (seq={S}, d_model={D}) incompatible with "
                             f"pe table (window={self.window}, d_model={self.d_model})")
        return add_positional_encoding(x, self._flat_pe(S, x.dtype), donate_x=donate_x)


if __name__ == "__main__":
    key = jax.random.PRNGKey(0)

    # Primary demo (lane-dense path: S*D = 256 is a multiple of 128).
    batch, seq, d_model, window = 2, 8, 32, 16
    enc = PositionalEncoder(d_model, window)
    x = jax.random.normal(key, (batch, seq, d_model), dtype=jnp.float32)
    out = jax.block_until_ready(enc(x))
    ref = x + jnp.asarray(enc.pe[None, :seq, :])
    assert out.shape == (batch, seq, d_model)
    assert jnp.allclose(out, ref, atol=1e-6), "mismatch vs reference (f32)"

    # Padded path: S*D = 120 (not % 128) and B = 2 (not % 8).
    k1 = jax.random.PRNGKey(1)
    seq2, d2, win2 = 5, 24, 8
    enc2 = PositionalEncoder(d2, win2)
    xp = jax.random.normal(k1, (batch, seq2, d2), dtype=jnp.float32)
    outp = jax.block_until_ready(enc2(xp))
    refp = xp + jnp.asarray(enc2.pe[None, :seq2, :])
    assert jnp.allclose(outp, refp, atol=1e-6), "mismatch vs reference (padded)"

    # bf16 path: exercises the dtype-aware sublane base (16 rows) and the
    # f32-accumulate-then-cast store.
    k2 = jax.random.PRNGKey(2)
    xb = jax.random.normal(k2, (batch, seq, d_model), dtype=jnp.bfloat16)
    outb = jax.block_until_ready(enc(xb))
    pe_b = jnp.asarray(enc.pe[:seq, :]).astype(jnp.bfloat16).astype(jnp.float32)
    refb = (xb.astype(jnp.float32) + pe_b[None]).astype(jnp.bfloat16)
    assert jnp.allclose(outb.astype(jnp.float32), refb.astype(jnp.float32),
                        atol=2e-2), "mismatch vs reference (bf16)"

    print("KERNEL_OK")
</pallas_src>

<mosaic_0001>
module attributes {stable_mosaic.version = 11 : i64} {
  func.func @_add_pe_kernel(%arg0: i32, %arg1: i32, %arg2: memref<8x256xf32, #tpu.memory_space<vmem>>, %arg3: memref<1x256xf32, #tpu.memory_space<vmem>>, %arg4: memref<8x256xf32, #tpu.memory_space<vmem>>) attributes {dimension_semantics = [#tpu.dimension_semantics<parallel>, #tpu.dimension_semantics<parallel>], iteration_bounds = array<i64: 1, 1>, scalar_prefetch = 0 : i64, scratch_operands = 0 : i64, tpu.core_type = #tpu.core_type<tc>, window_params = [{transform_indices = @transform_0, window_bounds = array<i64: 8, 256>}, {transform_indices = @transform_1, window_bounds = array<i64: 1, 256>}, {transform_indices = @transform_2, window_bounds = array<i64: 8, 256>}]} {
    %c0 = arith.constant 0 : index
    %c0_0 = arith.constant 0 : index
    %0 = vector.load %arg2[%c0, %c0_0] : memref<8x256xf32, #tpu.memory_space<vmem>>, vector<8x256xf32>
    %c0_1 = arith.constant 0 : index
    %c0_2 = arith.constant 0 : index
    %1 = vector.load %arg3[%c0_1, %c0_2] : memref<1x256xf32, #tpu.memory_space<vmem>>, vector<1x256xf32>
    %2 = vector.broadcast %1 : vector<1x256xf32> to vector<8x256xf32>
    %3 = arith.addf %0, %2 : vector<8x256xf32>
    %c0_3 = arith.constant 0 : index
    %c0_4 = arith.constant 0 : index
    %4 = vector.load %arg4[%c0_3, %c0_4] : memref<8x256xf32, #tpu.memory_space<vmem>>, vector<8x256xf32>
    tpu.vector_store %arg4[%c0_3, %c0_4], %3 {strides = array<i32>} : memref<8x256xf32, #tpu.memory_space<vmem>>, vector<8x256xf32>,
    return
  }
  func.func @transform_0(%arg0: i32, %arg1: i32) -> (i32, i32) {
    %c0_i32 = arith.constant 0 : i32
    return %arg1, %arg0 : i32, i32
  }
  func.func @transform_1(%arg0: i32, %arg1: i32) -> (i32, i32) {
    %c0_i32 = arith.constant 0 : i32
    %c0_i32_0 = arith.constant 0 : i32
    return %c0_i32, %arg0 : i32, i32
  }
  func.func @transform_2(%arg0: i32, %arg1: i32) -> (i32, i32) {
    %c0_i32 = arith.constant 0 : i32
    return %arg1, %arg0 : i32, i32
  }
}

</mosaic_0001>

<bundles_post_ra>
// kernel: tpu_custom_call.1
= control target key start
LH: loop header
LB: loop body
LE: loop exit
PB: predicated region body
PF: predicated region fallthrough
CT: control target
= control target key end

     0   :  { %7 = vsyncpa [#allocation3], 0  ;;  %s151_s0 = inlined_call_operand.hbm [shape: f32[8,256], index: 0, kind: input, shape index: {}]   ;;  %s152_s1 = inlined_call_operand.vmem [shape: f32[1,256], index: 1, kind: input, shape index: {}]   ;;  %s153_s2 = inlined_call_operand.hbm [shape: f32[8,256], index: 2, kind: output, shape index: {}]  }
   0x1   :  { %8 = vsyncpa [#allocation4], 0  ;;  %s107_s9 = smov [#allocation2]   ;;  %s59_s13 = scalar_lea.hbm %s151_s0, 256 }
   0x2   :  { %s15_s10 = sshll.u32 %s107_s9, 4  ;;  %p60_p0 = scmp.ne.s32.totalorder %s151_s0, %s59_s13  ;;  %s16_s10 = int_to_ptr.vmem [resolvable:$true] %s15_s10 }
   0x3   :  { %p63_p1 = scmp.lt.u32.totalorder %s59_s13, %s151_s0 }
   0x5   :  { %p65_p2 = pnand %p63_p1, %p60_p0 }
   0x7   :  { %68 = shalt.err (!%p65_p2)
}
   0x8   :  { %s69_s18 = scalar_lea.vmem %s16_s10, 256  ;;  %p74_p4 = scmp.lt.s32.totalorder %s16_s10, %s16_s10 }
   0x9   :  { %p70_p3 = scmp.ne.s32.totalorder %s16_s10, %s69_s18  ;;  %p75_p5 = scmp.lt.s32.totalorder %s69_s18, %s69_s18 }
   0xb   :  { %p76_p6 = por %p75_p5, %p74_p4 }
   0xd   :  { %p77_p7 = pnand %p76_p6, %p70_p3 }
   0xf   :  { %80 = shalt.err (!%p77_p7)
}
  0x10   :  { %18 = dma.hbm_to_vmem [thread:$0]  %s151_s0, 256, %s16_s10, [#allocation3]  }
  0x11   :  { %103 = dma.done.wait [#allocation3], 256  }
  0x12   :  { %104 = vsyncadd [#allocation3], 4294967040  ;;  %v28_v0 = vlaneseq  ;;  %v24_v4 = vld [vmem:[#allocation2] sm:$0xff]  ;;  %v25_v6 = vld [vmem:[#allocation2 + $0x8] sm:$0xff]  ;;  %s108_s23 = smov [#allocation5]  }
  0x13   :  { %v26_v5 = vld [vmem:[%s152_s1] sm:$0x3]  ;;  %s48_s24 = sshll.u32 %s108_s23, 4  ;;  %s49_s24 = int_to_ptr.vmem [resolvable:$true] %s48_s24 }
  0x14   :  { %v29_v1 = vshrl.u32 %v28_v0, 7  ;;  %s81_s0 = scalar_lea.vmem %s49_s24, 256  ;;  %p86_p9 = scmp.lt.s32.totalorder %s49_s24, %s49_s24 }
  0x15   :  { %p82_p8 = scmp.ne.s32.totalorder %s49_s24, %s81_s0  ;;  %p87_p10 = scmp.lt.s32.totalorder %s81_s0, %s81_s0 }
  0x16   :  { %v30_v2 = vsub.s32 0, %v29_v1  ;;  %v34_v3 = vsub.s32 1, %v29_v1 }
  0x17   :  { %p88_p11 = por %p87_p10, %p86_p9 }
  0x18   :  { %v31_v7 = vrot.slane %v26_v5, %v30_v2  ;;  %v35_v8 = vrot.slane %v26_v5, %v34_v3 }
  0x19   :  { %p89_p12 = pnand %p88_p11, %p82_p8 }
  0x1a   :  { %v38_v9 = vadd.f32 %v31_v7, %v24_v4  ;;  %v39_v10 = vadd.f32 %v35_v8, %v25_v6 }
  0x1c   :  { %40 = vst [vmem:[#allocation5] sm:$0xff] %v38_v9  ;;  %41 = vst [vmem:[#allocation5 + $0x8] sm:$0xff] %v39_v10 }
  0x1d   :  { %92 = shalt.err (!%p89_p12)
}
  0x1e   :  { %s93_s1 = scalar_lea.hbm %s153_s2, 256 }
  0x1f   :  { %p94_p13 = scmp.ne.s32.totalorder %s153_s2, %s93_s1  ;;  %p97_p0 = scmp.lt.u32.totalorder %s93_s1, %s153_s2 }
  0x21   :  { %p99_p1 = pnand %p97_p0, %p94_p13 }
  0x23   :  { %102 = shalt.err (!%p99_p1)
}
  0x24   :  { %51 = dma.vmem_to_hbm [thread:$0]  %s49_s24, 256, %s153_s2, [#allocation4]  }
  0x25   :  { %105 = dma.done.wait [#allocation4], 256  }
  0x26   :  { %106 = vsyncadd [#allocation4], 4294967040 }
  0x27   :  { %55 = vsyncpa [#allocation3], 1 }
  0x28   :  { %56 = vsyncpa [#allocation4], 1 }

</bundles_post_ra>
